<compile_context>
chip_gen: v6e
topology: v6e:2x2x1
jax: 0.10.0
libtpu: 0.0.40
codegen_flags: <defaults>
</compile_context>

<pallas_src>
import jax
import jax.numpy as jnp
from jax.experimental import pallas as pl
from jax.experimental.pallas import tpu as pltpu

IN_DIM = 32
H1 = 300
H1_PAD = 384        # next multiple of 128 >= 300
H2 = 64
OUT = 10


def mlp_kernel(x_ref, w1_ref, b1_ref, w2_ref, b2_ref, w3_ref, b3_ref, o_ref):
    # In-kernel cast of the activation tile to the matmul compute dtype.
    x = x_ref[...].astype(w1_ref.dtype)

    # fc1 + relu  (bf16 operands -> fp32 accumulation on the MXU)
    h1 = jnp.dot(x, w1_ref[...], preferred_element_type=jnp.float32) + b1_ref[...]
    h1 = jnp.maximum(h1, 0.0).astype(w2_ref.dtype)   # fused epilogue -> bf16 h1

    # fc2 + relu
    h2 = jnp.dot(h1, w2_ref[...], preferred_element_type=jnp.float32) + b2_ref[...]
    h2 = jnp.maximum(h2, 0.0).astype(w3_ref.dtype)

    # fc3 + softmax(dim=-1)   (all softmax math in fp32, exact normalization)
    logits = jnp.dot(h2, w3_ref[...], preferred_element_type=jnp.float32) + b3_ref[...]
    m = jnp.max(logits, axis=-1, keepdims=True)
    e = jnp.exp(logits - m)
    denom = jnp.sum(e, axis=-1, keepdims=True)
    probs = e / denom                                  # exact: rows sum to 1

    # Lane-dense store: (tile, 10) -> (10, tile) (cheap XLU transpose).
    o_ref[...] = probs.T.astype(o_ref.dtype)


def prepare_params(params, *, use_bf16=True):
    """Zero-pad H1 300->384 and cast weights to the matmul compute dtype."""
    w1, b1, w2, b2, w3, b3 = (params[k] for k in ("w1", "b1", "w2", "b2", "w3", "b3"))
    pad = H1_PAD - H1
    w1p = jnp.pad(w1, ((0, 0), (0, pad)))      # (32, 384)
    b1p = jnp.pad(b1, ((0, 0), (0, pad)))      # (1, 384)  -> relu(0+0)=0 in pad cols
    w2p = jnp.pad(w2, ((0, pad), (0, 0)))      # (384, 64) -> pad rows contribute 0
    wdt = jnp.bfloat16 if use_bf16 else jnp.float32
    return (w1p.astype(wdt), b1p.astype(jnp.float32),
            w2p.astype(wdt), b2.astype(jnp.float32),
            w3.astype(wdt), b3.astype(jnp.float32))


def _round_up(n, m):
    return -(-n // m) * m


def _choose_tile(B, batch_tile):
    """Pick (tile, padded_batch).

    - B <= 256: single full-extent grid step (no per-step overhead added).
    - B  > 256: at least 2 grid steps (so ("parallel",) can shard the batch
      over v7x's two TensorCores), tile a multiple of 128 (v5e MXU) and of
      256 whenever possible (v6e/v7x MXU rows), capped at `batch_tile`.
    """
    if B <= 256:
        return B, B
    tile = min(batch_tile, max(128, _round_up((B + 1) // 2, 128)))
    return tile, _round_up(B, tile)


def simple_classifier_forward(x, params, *, batch_tile=1024, use_bf16=True):
    """x: (B, IN_DIM) float32. params: dict of (w1,b1,w2,b2,w3,b3) in fp32."""
    B, D = x.shape
    assert D == IN_DIM
    w1, b1, w2, b2, w3, b3 = prepare_params(params, use_bf16=use_bf16)

    tile, b_padded = _choose_tile(B, batch_tile)
    xk = x if b_padded == B else jnp.pad(x, ((0, b_padded - B), (0, 0)))
    grid = (b_padded // tile,)

    in_specs = [
        pl.BlockSpec((tile, D), lambda i: (i, 0)),   # x tile (f32; cast in-kernel)
        pl.BlockSpec(w1.shape, lambda i: (0, 0)),    # weights: VMEM-resident
        pl.BlockSpec(b1.shape, lambda i: (0, 0)),
        pl.BlockSpec(w2.shape, lambda i: (0, 0)),
        pl.BlockSpec(b2.shape, lambda i: (0, 0)),
        pl.BlockSpec(w3.shape, lambda i: (0, 0)),
        pl.BlockSpec(b3.shape, lambda i: (0, 0)),
    ]
    # Transposed (lane-dense) output: minor axis = batch tile, not 10.
    out_specs = pl.BlockSpec((OUT, tile), lambda i: (0, i))

    out_t = pl.pallas_call(
        mlp_kernel,
        out_shape=jax.ShapeDtypeStruct((OUT, b_padded), jnp.float32),
        grid=grid,
        in_specs=in_specs,
        out_specs=out_specs,
        compiler_params=pltpu.CompilerParams(
            dimension_semantics=("parallel",)),
    )(xk, w1, b1, w2, b2, w3, b3)

    out = out_t.T                                   # (b_padded, OUT)
    return out[:B] if b_padded != B else out


def init_params(key, in_dim=IN_DIM):
    """Deterministic init matching PyTorch nn.Linear default
    (uniform(-1/sqrt(fan_in), 1/sqrt(fan_in)))."""
    ks = jax.random.split(key, 6)

    def linear(kw, kb, fan_in, fan_out):
        bound = 1.0 / jnp.sqrt(fan_in)
        w = jax.random.uniform(kw, (fan_in, fan_out), jnp.float32, -bound, bound)
        b = jax.random.uniform(kb, (1, fan_out), jnp.float32, -bound, bound)
        return w, b

    w1, b1 = linear(ks[0], ks[1], in_dim, H1)
    w2, b2 = linear(ks[2], ks[3], H1, H2)
    w3, b3 = linear(ks[4], ks[5], H2, OUT)
    return {"w1": w1, "b1": b1, "w2": w2, "b2": b2, "w3": w3, "b3": b3}


def _reference(x, params):
    h1 = jnp.maximum(x @ params["w1"] + params["b1"], 0.0)
    h2 = jnp.maximum(h1 @ params["w2"] + params["b2"], 0.0)
    return jax.nn.softmax(h2 @ params["w3"] + params["b3"], axis=-1)


if __name__ == "__main__":
    key = jax.random.PRNGKey(0)
    k_x, k_p = jax.random.split(key)
    params = init_params(k_p)

    # Small batch: single-grid-step path, bf16 matmuls.
    B = 8
    x = jax.random.normal(k_x, (B, IN_DIM), jnp.float32)
    out = jax.block_until_ready(simple_classifier_forward(x, params))
    ref = _reference(x, params)
    assert out.shape == (B, OUT)
    # Exact normalization -> rows sum to 1 to fp32 precision.
    assert jnp.allclose(jnp.sum(out, axis=-1), 1.0, atol=1e-4)
    # bf16 matmul operands -> loose (but ample) tolerance vs fp32 reference.
    assert jnp.allclose(out, ref, atol=4e-2)

    # Ragged larger batch: multi-step grid + pad/slice + transposed writeback path.
    B2 = 300
    x2 = jax.random.normal(k_x, (B2, IN_DIM), jnp.float32)
    out2 = jax.block_until_ready(simple_classifier_forward(x2, params))
    ref2 = _reference(x2, params)
    assert out2.shape == (B2, OUT)
    assert jnp.allclose(jnp.sum(out2, axis=-1), 1.0, atol=1e-4)
    assert jnp.allclose(out2, ref2, atol=4e-2)

    print("KERNEL_OK")
</pallas_src>

<mosaic_0001>
module attributes {stable_mosaic.version = 11 : i64} {
  func.func @mlp_kernel(%arg0: i32, %arg1: memref<8x32xf32, #tpu.memory_space<vmem>>, %arg2: memref<32x384xbf16, #tpu.memory_space<vmem>>, %arg3: memref<1x384xf32, #tpu.memory_space<vmem>>, %arg4: memref<384x64xbf16, #tpu.memory_space<vmem>>, %arg5: memref<1x64xf32, #tpu.memory_space<vmem>>, %arg6: memref<64x10xbf16, #tpu.memory_space<vmem>>, %arg7: memref<1x10xf32, #tpu.memory_space<vmem>>, %arg8: memref<10x8xf32, #tpu.memory_space<vmem>>) attributes {dimension_semantics = [#tpu.dimension_semantics<parallel>], iteration_bounds = array<i64: 1>, scalar_prefetch = 0 : i64, scratch_operands = 0 : i64, tpu.core_type = #tpu.core_type<tc>, window_params = [{transform_indices = @transform_0, window_bounds = array<i64: 8, 32>}, {pipeline_mode = #tpu.pipeline_mode<synchronous>, transform_indices = @transform_1, window_bounds = array<i64: 32, 384>}, {pipeline_mode = #tpu.pipeline_mode<synchronous>, transform_indices = @transform_2, window_bounds = array<i64: 1, 384>}, {pipeline_mode = #tpu.pipeline_mode<synchronous>, transform_indices = @transform_3, window_bounds = array<i64: 384, 64>}, {pipeline_mode = #tpu.pipeline_mode<synchronous>, transform_indices = @transform_4, window_bounds = array<i64: 1, 64>}, {pipeline_mode = #tpu.pipeline_mode<synchronous>, transform_indices = @transform_5, window_bounds = array<i64: 64, 10>}, {pipeline_mode = #tpu.pipeline_mode<synchronous>, transform_indices = @transform_6, window_bounds = array<i64: 1, 10>}, {transform_indices = @transform_7, window_bounds = array<i64: 10, 8>}]} {
    %c0 = arith.constant 0 : index
    %c0_0 = arith.constant 0 : index
    %0 = vector.load %arg1[%c0, %c0_0] : memref<8x32xf32, #tpu.memory_space<vmem>>, vector<8x32xf32>
    %1 = arith.truncf %0 : vector<8x32xf32> to vector<8x32xbf16>
    %c0_1 = arith.constant 0 : index
    %c0_2 = arith.constant 0 : index
    %2 = vector.load %arg2[%c0_1, %c0_2] : memref<32x384xbf16, #tpu.memory_space<vmem>>, vector<32x384xbf16>
    %cst = arith.constant dense<0.000000e+00> : vector<8x384xf32>
    %3 = tpu.matmul %1, %2, %cst {dimension_numbers = #tpu.dot_dimension_numbers<[1], [0], [0], [1], [0, 0, 1, 1], [], []>} : vector<8x32xbf16>, vector<32x384xbf16>, vector<8x384xf32> -> vector<8x384xf32>
    %c0_3 = arith.constant 0 : index
    %c0_4 = arith.constant 0 : index
    %4 = vector.load %arg3[%c0_3, %c0_4] : memref<1x384xf32, #tpu.memory_space<vmem>>, vector<1x384xf32>
    %5 = vector.broadcast %4 : vector<1x384xf32> to vector<8x384xf32>
    %6 = arith.addf %3, %5 : vector<8x384xf32>
    %cst_5 = arith.constant 0.000000e+00 : f32
    %7 = vector.broadcast %cst_5 : f32 to vector<8x384xf32>
    %8 = arith.maximumf %6, %7 : vector<8x384xf32>
    %9 = arith.truncf %8 : vector<8x384xf32> to vector<8x384xbf16>
    %c0_6 = arith.constant 0 : index
    %c0_7 = arith.constant 0 : index
    %10 = vector.load %arg4[%c0_6, %c0_7] : memref<384x64xbf16, #tpu.memory_space<vmem>>, vector<384x64xbf16>
    %cst_8 = arith.constant dense<0.000000e+00> : vector<8x64xf32>
    %11 = tpu.matmul %9, %10, %cst_8 {dimension_numbers = #tpu.dot_dimension_numbers<[1], [0], [0], [1], [0, 0, 1, 1], [], []>} : vector<8x384xbf16>, vector<384x64xbf16>, vector<8x64xf32> -> vector<8x64xf32>
    %c0_9 = arith.constant 0 : index
    %c0_10 = arith.constant 0 : index
    %12 = vector.load %arg5[%c0_9, %c0_10] : memref<1x64xf32, #tpu.memory_space<vmem>>, vector<1x64xf32>
    %13 = vector.broadcast %12 : vector<1x64xf32> to vector<8x64xf32>
    %14 = arith.addf %11, %13 : vector<8x64xf32>
    %cst_11 = arith.constant 0.000000e+00 : f32
    %15 = vector.broadcast %cst_11 : f32 to vector<8x64xf32>
    %16 = arith.maximumf %14, %15 : vector<8x64xf32>
    %17 = arith.truncf %16 : vector<8x64xf32> to vector<8x64xbf16>
    %c0_12 = arith.constant 0 : index
    %c0_13 = arith.constant 0 : index
    %18 = vector.load %arg6[%c0_12, %c0_13] : memref<64x10xbf16, #tpu.memory_space<vmem>>, vector<64x10xbf16>
    %cst_14 = arith.constant dense<0.000000e+00> : vector<8x10xf32>
    %19 = tpu.matmul %17, %18, %cst_14 {dimension_numbers = #tpu.dot_dimension_numbers<[1], [0], [0], [1], [0, 0, 1, 1], [], []>} : vector<8x64xbf16>, vector<64x10xbf16>, vector<8x10xf32> -> vector<8x10xf32>
    %c0_15 = arith.constant 0 : index
    %c0_16 = arith.constant 0 : index
    %20 = vector.load %arg7[%c0_15, %c0_16] : memref<1x10xf32, #tpu.memory_space<vmem>>, vector<1x10xf32>
    %21 = vector.broadcast %20 : vector<1x10xf32> to vector<8x10xf32>
    %22 = arith.addf %19, %21 : vector<8x10xf32>
    %cst_17 = arith.constant dense<0xFF800000> : vector<8xf32>
    %23 = vector.multi_reduction <maximumf>, %22, %cst_17 [1] : vector<8x10xf32> to vector<8xf32>
    %24 = vector.shape_cast %23 : vector<8xf32> to vector<8x1xf32>
    %25 = vector.broadcast %24 : vector<8x1xf32> to vector<8x10xf32>
    %26 = arith.subf %22, %25 : vector<8x10xf32>
    %27 = math.exp %26 : vector<8x10xf32>
    %cst_18 = arith.constant dense<0.000000e+00> : vector<8xf32>
    %28 = vector.multi_reduction <add>, %27, %cst_18 [1] : vector<8x10xf32> to vector<8xf32>
    %29 = vector.shape_cast %28 : vector<8xf32> to vector<8x1xf32>
    %30 = vector.broadcast %29 : vector<8x1xf32> to vector<8x10xf32>
    %31 = arith.divf %27, %30 : vector<8x10xf32>
    %32 = tpu.transpose %31, [1, 0] : vector<8x10xf32> -> vector<10x8xf32>
    %c0_19 = arith.constant 0 : index
    %c0_20 = arith.constant 0 : index
    %33 = vector.load %arg8[%c0_19, %c0_20] : memref<10x8xf32, #tpu.memory_space<vmem>>, vector<10x8xf32>
    tpu.vector_store %arg8[%c0_19, %c0_20], %32 {strides = array<i32>} : memref<10x8xf32, #tpu.memory_space<vmem>>, vector<10x8xf32>,
    return
  }
  func.func @transform_0(%arg0: i32) -> (i32, i32) {
    %c0_i32 = arith.constant 0 : i32
    %c0_i32_0 = arith.constant 0 : i32
    return %arg0, %c0_i32 : i32, i32
  }
  func.func @transform_1(%arg0: i32) -> (i32, i32) {
    %c0_i32 = arith.constant 0 : i32
    %c0_i32_0 = arith.constant 0 : i32
    %c0_i32_1 = arith.constant 0 : i32
    return %c0_i32, %c0_i32_0 : i32, i32
  }
  func.func @transform_2(%arg0: i32) -> (i32, i32) {
    %c0_i32 = arith.constant 0 : i32
    %c0_i32_0 = arith.constant 0 : i32
    %c0_i32_1 = arith.constant 0 : i32
    return %c0_i32, %c0_i32_0 : i32, i32
  }
  func.func @transform_3(%arg0: i32) -> (i32, i32) {
    %c0_i32 = arith.constant 0 : i32
    %c0_i32_0 = arith.constant 0 : i32
    %c0_i32_1 = arith.constant 0 : i32
    return %c0_i32, %c0_i32_0 : i32, i32
  }
  func.func @transform_4(%arg0: i32) -> (i32, i32) {
    %c0_i32 = arith.constant 0 : i32
    %c0_i32_0 = arith.constant 0 : i32
    %c0_i32_1 = arith.constant 0 : i32
    return %c0_i32, %c0_i32_0 : i32, i32
  }
  func.func @transform_5(%arg0: i32) -> (i32, i32) {
    %c0_i32 = arith.constant 0 : i32
    %c0_i32_0 = arith.constant 0 : i32
    %c0_i32_1 = arith.constant 0 : i32
    return %c0_i32, %c0_i32_0 : i32, i32
  }
  func.func @transform_6(%arg0: i32) -> (i32, i32) {
    %c0_i32 = arith.constant 0 : i32
    %c0_i32_0 = arith.constant 0 : i32
    %c0_i32_1 = arith.constant 0 : i32
    return %c0_i32, %c0_i32_0 : i32, i32
  }
  func.func @transform_7(%arg0: i32) -> (i32, i32) {
    %c0_i32 = arith.constant 0 : i32
    %c0_i32_0 = arith.constant 0 : i32
    return %c0_i32, %arg0 : i32, i32
  }
}

</mosaic_0001>

<bundles_post_ra>
// kernel: tpu_custom_call.1
= control target key start
LH: loop header
LB: loop body
LE: loop exit
PB: predicated region body
PF: predicated region fallthrough
CT: control target
= control target key end

     0   :  { %v754_v1 = vmov 0   ;;  %vm86_vm0 = vcmask 261120   ;;  %v755_v11 = vmov 0.0   ;;  %vm756_vm1 = vmmov 0   ;;  %s939_s1 = inlined_call_operand.vmem [shape: bf16[32,384], index: 1, kind: input, shape index: {}]   ;;  %s940_s0 = inlined_call_operand.vmem [shape: f32[8,32], index: 0, kind: input, shape index: {}]   ;;  %s941_s3 = inlined_call_operand.vmem [shape: bf16[384,64], index: 3, kind: input, shape index: {}]   ;;  %s942_s5 = inlined_call_operand.vmem [shape: bf16[64,10], index: 5, kind: input, shape index: {}]   ;;  %s943_s2 = inlined_call_operand.vmem [shape: f32[1,384], index: 2, kind: input, shape index: {}]   ;;  %s944_s4 = inlined_call_operand.vmem [shape: f32[1,64], index: 4, kind: input, shape index: {}]   ;;  %s945_s6 = inlined_call_operand.vmem [shape: f32[1,10], index: 6, kind: input, shape index: {}]   ;;  %s946_s7 = inlined_call_operand.vmem [shape: f32[10,8], index: 7, kind: output, shape index: {}]  }
   0x1   :  { %v714_v0 = vld [vmem:[%s939_s1 + $0x1c] ss:$12 sps:$4 sm:$0xff]   ;;  %122 = vmatprep.mubr.bf16.mxu1 %v754_v1  ;;  %v716_v2 = vld [vmem:[%s939_s1 + $0x18] ss:$12 sps:$4 sm:$0xff]   ;;  %v719_v4 = vld [vmem:[%s939_s1] ss:$12 sps:$4 sm:$0xff]   ;;  %v39_v34 = vlaneseq }
   0x2   :  { %102 = vmatprep.subr.bf16.mxu1 %v714_v0  ;;  %v717_v3 = vld [vmem:[%s939_s1 + $0x4] ss:$12 sps:$4 sm:$0xff]   ;;  %v720_v6 = vld [vmem:[%s939_s1 + $0x20] ss:$12 sps:$4 sm:$0xff]   ;;  %v722_v7 = vld [vmem:[%s941_s3 + $0x78] sm:$0xff]   ;;  %vm497_vm2 = vcmask 523264  }
   0x3   :  { %103 = vmatpush1.bf16.msra.mxu1 %v716_v2  ;;  %v27_v5 = vld [vmem:[%s940_s0] sm:$0xff]  ;;  %v723_v9 = vld [vmem:[%s941_s3 + $0x38] sm:$0xff]   ;;  %635 = vmatprep.subr.bf16.mxu0 %v722_v7  ;;  %v724_v10 = vld [vmem:[%s941_s3 + $0x70] sm:$0xff]   ;;  %v40_v35 = vshrl.u32 %v39_v34, 7  ;;  %vm541_vm3 = vcmask 80896   ;;  %vm585_vm4 = vcmask 64512  }
   0x4   :  { %104 = vmatprep.subr.bf16.mxu1 %v717_v3  ;;  %v28_v8 = vpack.c.bf16 %v27_v5, %v27_v5  ;;  %636 = vmatpush3.bf16.msra.mxu0 %v723_v9  ;;  %v725_v12 = vld [vmem:[%s941_s3 + $0x30] sm:$0xff]   ;;  %v727_v13 = vld [vmem:[%s941_s3 + $0x68] sm:$0xff]   ;;  %v730_v16 = vld [vmem:[%s941_s3 + $0x60] sm:$0xff]   ;;  %vm587_vm5 = vcmask 58368  }
   0x5   :  { %637 = vmatprep.subr.bf16.mxu0 %v724_v10  ;;  %v721_v14 = vld [vmem:[%s939_s1 + $0x8] ss:$12 sps:$4 sm:$0xff]   ;;  %v726_v17 = vld [vmem:[%s941_s3 + $0xb8] sm:$0xff]   ;;  %v731_v18 = vld [vmem:[%s941_s3 + $0x20] sm:$0xff]   ;;  %v41_v36 = vsub.s32 0, %v40_v35  ;;  %v45_v38 = vsub.s32 1, %v40_v35 }
   0x6   :  { %v728_v15 = vld [vmem:[%s941_s3 + $0x28] sm:$0xff]   ;;  %v733_v19 = vld [vmem:[%s941_s3 + $0x58] sm:$0xff]   ;;  %v729_v20 = vld [vmem:[%s941_s3 + $0xb0] sm:$0xff]   ;;  %v49_v43 = vsub.s32 2, %v40_v35 }
   0x7   :  { %105 = vmatpush1.bf16.msra.mxu1 %v719_v4  ;;  %v734_v21 = vld [vmem:[%s941_s3 + $0x18] sm:$0xff]   ;;  %v732_v22 = vld [vmem:[%s941_s3 + $0xa8] sm:$0xff]   ;;  %v736_v23 = vld [vmem:[%s941_s3 + $0x50] sm:$0xff]  }
   0x8   :  { %671 = vmatprep.subr.bf16.mxu1 %v755_v11  ;;  %638 = vmatpush3.bf16.msra.mxu0 %v725_v12  ;;  %v737_v24 = vld [vmem:[%s941_s3 + $0x10] sm:$0xff]   ;;  %v735_v25 = vld [vmem:[%s941_s3 + $0xa0] sm:$0xff]   ;;  %v738_v26 = vld [vmem:[%s941_s3 + $0x98] sm:$0xff]  }
   0x9   :  { %639 = vmatprep.subr.bf16.mxu0 %v727_v13  ;;  %v739_v27 = vld [vmem:[%s941_s3 + $0x48] sm:$0xff]   ;;  %v741_v29 = vld [vmem:[%s941_s3 + $0x90] sm:$0xff]   ;;  %v742_v30 = vld [vmem:[%s941_s3 + $0x40] sm:$0xff]  }
   0xa   :  { %599 = vmatmul.mubr.msk.bf16.vlgmr.msra.gmra.mxu1 %vm86_vm0, %v28_v8  ;;  %v740_v28 = vld [vmem:[%s941_s3 + $0x8] sm:$0xff]   ;;  %v743_v31 = vld [vmem:[%s941_s3] sm:$0xff]   ;;  %v746_v52 = vld [vmem:[%s942_s5 + $0x18] sm:$0xff]  }
   0xb   :  { %672 = vmatpush3.bf16.msra.mxu1 %v720_v6  ;;  %675 = vmatprep.mubr.msk.bf16.mxu1 %vm756_vm1, %v755_v11  ;;  %v744_v32 = vld [vmem:[%s941_s3 + $0x88] sm:$0xff]   ;;  %v745_v33 = vld [vmem:[%s941_s3 + $0x80] sm:$0xff]   ;;  %v747_v61 = vld [vmem:[%s942_s5 + $0x10] sm:$0xff]  }
   0xc   :  { %673 = vmatprep.subr.bf16.mxu1 %v755_v11  ;;  %640 = vmatpush3.bf16.msra.mxu0 %v728_v15  ;;  %v37_v37 = vld [vmem:[%s943_s2] sm:$0x7]  ;;  %v748_v62 = vld [vmem:[%s942_s5 + $0x8] sm:$0xff]  }
   0xd   :  { %641 = vmatprep.subr.bf16.mxu0 %v730_v16  ;;  %v42_v39 = vrot.slane %v37_v37, %v41_v36  ;;  %v46_v40 = vrot.slane %v37_v37, %v45_v38  ;;  %v50_v48 = vrot.slane %v37_v37, %v49_v43  ;;  %v749_v63 = vld [vmem:[%s942_s5] sm:$0xff]  }
   0xe   :  { %v601_v2 = vld [vmem:[%s944_s4] ss:$0 sm:$0xff] }
   0xf   :  { %674 = vmatpush3.bf16.msra.mxu1 %v721_v14  ;;  %v626_v14 = vld [vmem:[%s945_s6] ss:$0 sm:$0xff] }
  0x10   :  { %679 = vmatprep.subr.bf16.mxu1 %v755_v11  ;;  %642 = vmatpush3.bf16.msra.mxu0 %v731_v18 }
  0x11   :  { %643 = vmatprep.subr.bf16.mxu0 %v733_v19 }
  0x12   :  { %676 = vmatmul.mubr.msk.bf16.vlgmr.msra.gmra.mxu1 %vm86_vm0, %v28_v8 }
  0x13   :  { %680 = vmatpush3.bf16.msra.mxu1 %v726_v17  ;;  %695 = vmatprep.mubr.msk.bf16.mxu1 %vm756_vm1, %v755_v11 }
  0x14   :  { %681 = vmatprep.subr.bf16.mxu1 %v755_v11  ;;  %644 = vmatpush3.bf16.msra.mxu0 %v734_v21 }
  0x15   :  { %645 = vmatprep.subr.bf16.mxu0 %v736_v23 }
  0x17   :  { %682 = vmatpush3.bf16.msra.mxu1 %v729_v20 }
  0x18   :  { %683 = vmatprep.subr.bf16.mxu1 %v755_v11  ;;  %646 = vmatpush3.bf16.msra.mxu0 %v737_v24 }
  0x19   :  { %647 = vmatprep.subr.bf16.mxu0 %v739_v27 }
  0x1b   :  { %684 = vmatpush3.bf16.msra.mxu1 %v732_v22 }
  0x1c   :  { %685 = vmatprep.subr.bf16.mxu1 %v755_v11  ;;  %648 = vmatpush3.bf16.msra.mxu0 %v740_v28 }
  0x1d   :  { %649 = vmatprep.subr.bf16.mxu0 %v742_v30 }
  0x1f   :  { %686 = vmatpush3.bf16.msra.mxu1 %v735_v25 }
  0x20   :  { %687 = vmatprep.subr.bf16.mxu1 %v755_v11  ;;  %650 = vmatpush3.bf16.msra.mxu0 %v743_v31 }
  0x21   :  { %699 = vmatprep.subr.bf16.mxu0 %v755_v11 }
  0x23   :  { %688 = vmatpush3.bf16.msra.mxu1 %v738_v26 }
  0x24   :  { %689 = vmatprep.subr.bf16.mxu1 %v755_v11 }
  0x27   :  { %690 = vmatpush3.bf16.msra.mxu1 %v741_v29 }
  0x28   :  { %691 = vmatprep.subr.bf16.mxu1 %v755_v11 }
  0x2b   :  { %692 = vmatpush3.bf16.msra.mxu1 %v744_v32 }
  0x2c   :  { %693 = vmatprep.subr.bf16.mxu1 %v755_v11 }
  0x2f   :  { %694 = vmatpush3.bf16.msra.mxu1 %v745_v33 }
  0xca   :  { %v124_v41 = vpop.f32.mrf.mxu1 }
  0xcb   :  { %v125_v42 = vadd.f32 %v124_v41, %v42_v39 }
  0xcc   :  { %v126_v44 = vpop.f32.mrf.mxu1 }
  0xcd   :  { %v127_v45 = vadd.f32 %v126_v44, %v46_v40  ;;  %v171_v46 = vmax.f32 %v125_v42, 0.0 }
  0xce   :  { %v128_v47 = vpop.f32.mrf.mxu1 }
  0xcf   :  { %v172_v49 = vmax.f32 %v127_v45, 0.0  ;;  %v174_v53 = vpack.c.bf16 %v171_v46, %v171_v46 }
  0xd0   :  { %v129_v50 = vpop.f32.mrf.mxu1 }
  0xd1   :  { %v175_v51 = vpack.c.bf16 %v172_v49, %v172_v49 }
  0xd2   :  { %v165_v54 = vpop.f32.mrf.mxu1 }
  0xd3   :  { %v166_v55 = vadd.f32 %v165_v54, %v50_v48  ;;  %408 = vmatprep.mubr.bf16.mxu0 %v175_v51 }
  0xd4   :  { %v677_v56 = vpop.f32.mrf.mxu1  ;;  %409 = vmatmul.mubr.bf16.vlgmr.msra.gmra.mxu0 %v174_v53 }
  0xd5   :  { %v173_v57 = vmax.f32 %v166_v55, 0.0  ;;  %700 = vmatpush3.bf16.msra.mxu0 %v746_v52  ;;  %707 = vmatprep.mubr.msk.bf16.mxu0 %vm756_vm1, %v755_v11 }
  0xd6   :  { %v168_v58 = vpop.f32.mrf.mxu1  ;;  %701 = vmatprep.subr.bf16.mxu0 %v755_v11 }
  0xd7   :  { %v176_v59 = vpack.c.bf16 %v173_v57, %v173_v57 }
  0xd8   :  { %v678_v60 = vpop.f32.mrf.mxu1 }
  0xd9   :  { %696 = vmatmul.mubr.bf16.vlgmr.msra.gmra.mxu1 %v176_v59  ;;  %702 = vmatpush3.bf16.msra.mxu0 %v747_v61 }
  0xda   :  { %703 = vmatprep.subr.bf16.mxu0 %v755_v11 }
  0xdd   :  { %704 = vmatpush3.bf16.msra.mxu0 %v748_v62 }
  0xde   :  { %705 = vmatprep.subr.bf16.mxu0 %v755_v11 }
  0xe1   :  { %706 = vmatpush3.bf16.msra.mxu0 %v749_v63 }
 0x194   :  { %v651_v0 = vpop.f32.mrf.mxu0 }
 0x196   :  { %v652_v1 = vpop.f32.mrf.mxu0 }
 0x197   :  { %v653_v3 = vadd.f32 %v652_v1, %v651_v0 }
 0x198   :  { %v654_v4 = vpop.f32.mrf.mxu0 }
 0x199   :  { %v411_v5 = vadd.f32 %v653_v3, %v601_v2  ;;  %v450_v6 = vpop.f32.mrf.mxu1 }
 0x19a   :  { %v655_v7 = vpop.f32.mrf.mxu0 }
 0x19b   :  { %v451_v8 = vadd.f32 %v450_v6, %v411_v5  ;;  %v697_v9 = vpop.f32.mrf.mxu1 }
 0x19d   :  { %v456_v10 = vmax.f32 %v451_v8, 0.0  ;;  %v453_v11 = vpop.f32.mrf.mxu1 }
 0x19f   :  { %v457_v12 = vpack.c.bf16 %v456_v10, %v456_v10  ;;  %v698_v13 = vpop.f32.mrf.mxu1 }
 0x1a1   :  { %708 = vmatmul.mubr.msk.bf16.vlgmr.msra.gmra.mxu0 %vm497_vm2, %v457_v12 }
 0x261   :  { %v535_v15 = vpop.f32.mrf.mxu0 }
 0x262   :  { %v536_v16 = vadd.f32 %v626_v14, %v535_v15 }
 0x263   :  { %v709_v17 = vpop.f32.mrf.mxu0 }
 0x264   :  { %v542_v18 = vsel %vm541_vm3, %v536_v16, -inf }
 0x265   :  { %543 = vmax.xlane.f32.xlu0 %v542_v18  ;;  %v538_v19 = vpop.f32.mrf.mxu0 }
 0x267   :  { %v710_v20 = vpop.f32.mrf.mxu0 }
 0x2ee   :  { %v544_v21 = vpop.xlane.xlu0 %543 }
 0x2ef   :  { %v545_v22 = vsub.f32 %v536_v16, %v544_v21 }
 0x2f1   :  { %v546_v23 = vmul.f32 1.442695, %v545_v22 }
 0x2f3   :  { %750 = vpow2.f32 %v546_v23 }
 0x300   :  { %v751_v24 = vpop.eup %750 }
 0x301   :  { %v548_v25 = vsel %vm541_vm3, %v751_v24, 0.0 }
 0x302   :  { %549 = vadd.xlane.f32.xlu0 %v548_v25 }
 0x38b   :  { %v550_v26 = vpop.xlane.xlu0 %549 }
 0x38c   :  { %752 = vrcp.f32 %v550_v26 }
 0x399   :  { %v753_v27 = vpop.eup %752 }
 0x39a   :  { %v552_v28 = vmul.f32 %v753_v27, %v751_v24 }
 0x39c   :  { %553 = vxpose.xlu1.b32.start.end [1/1] (short) (narrow) %v552_v28, 16 }
 0x418   :  { %v569_v29 = vpop.trf.xlu1 }
 0x419   :  { %586 = vst.msk [vmem:[%s946_s7] sm:$0xff] %vm585_vm4, %v569_v29 }
 0x41c   :  { %v570_v30 = vpop.trf.xlu1 }
 0x41d   :  { %588 = vst.msk [vmem:[%s946_s7 + $0x8] sm:$0x3] %vm587_vm5, %v570_v30 }

</bundles_post_ra>
